<compile_context>
chip_gen: v5e
topology: v5e:2x2
jax: 0.10.0
libtpu: 0.0.40
codegen_flags: <defaults>
</compile_context>

<pallas_src>
import jax
import jax.numpy as jnp
from jax.experimental import pallas as pl
from jax.experimental.pallas import tpu as pltpu


def ffn_kernel(x_ref, w1_ref, b1_ref, w2_ref, b2_ref, o_ref):
    # x_ref:   (TM, DM)   row tile (block index constant across the d_ff axis)
    # w1_ref:  (DM, TFF)  d_ff chunk of W1
    # b1_ref:  (1, TFF)   d_ff chunk of b1 (f32)
    # w2_ref:  (TFF, DM)  d_ff chunk of W2
    # b2_ref:  (1, DM)    full b2 (f32)
    # o_ref:   (TM, DM)   f32 output block, used directly as the accumulator
    k = pl.program_id(1)

    @pl.when(k == 0)
    def _():
        o_ref[...] = jnp.zeros_like(o_ref)

    h = jnp.dot(x_ref[...], w1_ref[...], preferred_element_type=jnp.float32)
    h = jnp.maximum(h + b1_ref[...], 0.0)                      # bias + ReLU on the VPU
    o_ref[...] += jnp.dot(h.astype(w2_ref.dtype), w2_ref[...],
                          preferred_element_type=jnp.float32)

    @pl.when(k == pl.num_programs(1) - 1)
    def _():
        o_ref[...] += b2_ref[...]


def _round_up(a, b):
    return (a + b - 1) // b * b


def _vmem_capacity_bytes():
    try:
        info = pltpu.get_tpu_info()
        return int(getattr(info, "vmem_capacity_bytes", 128 * 1024 * 1024))
    except Exception:
        return 128 * 1024 * 1024


def position_wise_feed_forward(x, w1, b1, w2, b2, *, tile_rows=512, tile_ff=512,
                               compute_dtype=None):
    """FFN(x) = ReLU(x @ W1 + b1) @ W2 + b2, with x: (batch, seq, d_model)."""
    batch, seq, d_model = x.shape
    d_ff = w1.shape[1]
    rows = batch * seq

    out_dtype = x.dtype
    cdt = jnp.dtype(compute_dtype) if compute_dtype is not None else jnp.dtype(x.dtype)
    in_isz = cdt.itemsize

    # Lane-dense (multiple-of-128) padded feature dims. d_ff is padded only to 128,
    # not to the tile size, so no padded d_ff columns are ever streamed/multiplied.
    dm_p = _round_up(d_model, 128)
    dff_p = _round_up(d_ff, 128)

    # ---- Per-generation VMEM budget & tile selection -------------------------------
    vmem_cap = _vmem_capacity_bytes()          # 64 MiB on v7x, 128 MiB on v5e/v6e
    vmem_limit = vmem_cap * 3 // 4             # ~48 MiB (v7x) / ~96 MiB (v5e/v6e)
    budget = int(vmem_limit * 0.9)             # headroom for compiler scratch

    # d_ff tile candidates: multiples of 128 that divide dff_p (largest first).
    tff_opts = sorted((t for t in range(128, dff_p + 1, 128) if dff_p % t == 0),
                      reverse=True)
    tff = next((t for t in tff_opts if t <= max(tile_ff, 128)), 128)

    # Row tile: multiple of 8, clamped to the problem, and split so we get >= 2 row
    # tiles whenever possible (lets both v7x TensorCores work on small batch*seq).
    tm = min(tile_rows, _round_up(rows, 8))
    if _round_up(rows, tm) // tm < 2 and tm > 8:
        tm = max(8, _round_up(-(-rows // 2), 8))

    def vmem_need(tm_, tff_):
        # double-buffered input tiles + double-buffered f32 resident output tile
        inputs = tm_ * dm_p + dm_p * tff_ + tff_ + tff_ * dm_p + dm_p
        return 2 * in_isz * inputs + 2 * 4 * tm_ * dm_p

    # Shrink tff first (weight HBM traffic is independent of tff), then tm.
    while vmem_need(tm, tff) > budget:
        smaller = [t for t in tff_opts if t < tff]
        if smaller:
            tff = smaller[0]
        elif tm > 8:
            tm = max(8, tm // 2)
        else:
            break

    rows_p = _round_up(rows, tm)
    grid = (rows_p // tm, dff_p // tff)

    # ---- Pad & cast inputs -----------------------------------------------------------
    # Zero padding contributes exact zeros to the real output region; padded rows/cols
    # are sliced off below.
    x2d = jnp.pad(x.reshape(rows, d_model),
                  ((0, rows_p - rows), (0, dm_p - d_model))).astype(cdt)
    w1_p = jnp.pad(w1, ((0, dm_p - d_model), (0, dff_p - d_ff))).astype(cdt)
    w2_p = jnp.pad(w2, ((0, dff_p - d_ff), (0, dm_p - d_model))).astype(cdt)
    b1_p = jnp.pad(b1, (0, dff_p - d_ff)).reshape(1, dff_p).astype(jnp.float32)
    b2_p = jnp.pad(b2, (0, dm_p - d_model)).reshape(1, dm_p).astype(jnp.float32)

    # ---- Cost estimate (counts weight re-streaming once per row tile) ----------------
    n_row_tiles = rows_p // tm
    cost = pl.CostEstimate(
        flops=int(4 * rows_p * dm_p * dff_p),                 # two matmuls: 2*M*K*N each
        transcendentals=0,
        bytes_accessed=int(x2d.size * in_isz
                           + n_row_tiles * (w1_p.size + w2_p.size) * in_isz
                           + n_row_tiles * (b1_p.size + b2_p.size) * 4
                           + rows_p * dm_p * 4),
    )

    out2d = pl.pallas_call(
        ffn_kernel,
        out_shape=jax.ShapeDtypeStruct((rows_p, dm_p), jnp.float32),
        grid_spec=pltpu.PrefetchScalarGridSpec(
            num_scalar_prefetch=0,
            grid=grid,
            in_specs=[
                pl.BlockSpec((tm, dm_p), lambda i, k: (i, 0)),    # x row tile
                pl.BlockSpec((dm_p, tff), lambda i, k: (0, k)),   # W1 d_ff chunk
                pl.BlockSpec((1, tff), lambda i, k: (0, k)),      # b1 d_ff chunk
                pl.BlockSpec((tff, dm_p), lambda i, k: (k, 0)),   # W2 d_ff chunk
                pl.BlockSpec((1, dm_p), lambda i, k: (0, 0)),     # b2 (full)
            ],
            out_specs=pl.BlockSpec((tm, dm_p), lambda i, k: (i, 0)),
        ),
        compiler_params=pltpu.CompilerParams(
            dimension_semantics=("parallel", "arbitrary"),
            vmem_limit_bytes=int(vmem_limit),
        ),
        cost_estimate=cost,
    )(x2d, w1_p, b1_p, w2_p, b2_p)

    return out2d[:rows, :d_model].astype(out_dtype).reshape(batch, seq, d_model)


if __name__ == "__main__":
    batch, seq, d_model, d_ff = 2, 8, 32, 64

    key = jax.random.PRNGKey(0)
    kx, kw1, kb1, kw2, kb2 = jax.random.split(key, 5)

    x = jax.random.normal(kx, (batch, seq, d_model), dtype=jnp.float32)
    # Parameters follow nn.Linear(d_model, d_ff) / nn.Linear(d_ff, d_model), stored
    # transposed for the x @ W convention.
    w1 = jax.random.normal(kw1, (d_model, d_ff), dtype=jnp.float32) * 0.02
    b1 = jax.random.normal(kb1, (d_ff,), dtype=jnp.float32) * 0.02
    w2 = jax.random.normal(kw2, (d_ff, d_model), dtype=jnp.float32) * 0.02
    b2 = jax.random.normal(kb2, (d_model,), dtype=jnp.float32) * 0.02

    # Pure-JAX reference of the forward-pass semantics (eval-mode dropout = identity).
    ref = jnp.maximum(x @ w1 + b1, 0.0) @ w2 + b2

    # f32 path (bit-for-bit semantics of the PyTorch module).
    out = position_wise_feed_forward(x, w1, b1, w2, b2)
    jax.block_until_ready(out)
    assert out.shape == (batch, seq, d_model)
    assert jnp.allclose(out, ref, atol=1e-5, rtol=1e-5)

    # bf16 MXU path (native MXU rate, f32 accumulation) — looser tolerance expected.
    out_bf16 = position_wise_feed_forward(x, w1, b1, w2, b2,
                                          compute_dtype=jnp.bfloat16)
    jax.block_until_ready(out_bf16)
    assert jnp.allclose(out_bf16, ref, atol=2e-2, rtol=2e-2)

    print("KERNEL_OK")
</pallas_src>

<mosaic_0001>
module attributes {stable_mosaic.version = 11 : i64} {
  func.func @ffn_kernel(%arg0: i32, %arg1: i32, %arg2: memref<8x128xf32, #tpu.memory_space<vmem>>, %arg3: memref<128x128xf32, #tpu.memory_space<vmem>>, %arg4: memref<1x128xf32, #tpu.memory_space<vmem>>, %arg5: memref<128x128xf32, #tpu.memory_space<vmem>>, %arg6: memref<1x128xf32, #tpu.memory_space<vmem>>, %arg7: memref<8x128xf32, #tpu.memory_space<vmem>>) attributes {dimension_semantics = [#tpu.dimension_semantics<parallel>, #tpu.dimension_semantics<arbitrary>], iteration_bounds = array<i64: 2, 1>, scalar_prefetch = 0 : i64, scratch_operands = 0 : i64, tpu.core_type = #tpu.core_type<tc>, window_params = [{transform_indices = @transform_0, window_bounds = array<i64: 8, 128>}, {transform_indices = @transform_1, window_bounds = array<i64: 128, 128>}, {transform_indices = @transform_2, window_bounds = array<i64: 1, 128>}, {transform_indices = @transform_3, window_bounds = array<i64: 128, 128>}, {pipeline_mode = #tpu.pipeline_mode<synchronous>, transform_indices = @transform_4, window_bounds = array<i64: 1, 128>}, {transform_indices = @transform_5, window_bounds = array<i64: 8, 128>}]} {
    %c0_i32 = arith.constant 0 : i32
    %0 = arith.cmpi eq, %arg1, %c0_i32 : i32
    %1 = arith.extui %0 : i1 to i32
    %c0_i32_0 = arith.constant 0 : i32
    %2 = arith.cmpi ne, %1, %c0_i32_0 : i32
    scf.if %2 {
      %cst_16 = arith.constant 0.000000e+00 : f32
      %19 = vector.broadcast %cst_16 : f32 to vector<8x128xf32>
      %c0_17 = arith.constant 0 : index
      %c0_18 = arith.constant 0 : index
      %20 = vector.load %arg7[%c0_17, %c0_18] : memref<8x128xf32, #tpu.memory_space<vmem>>, vector<8x128xf32>
      tpu.vector_store %arg7[%c0_17, %c0_18], %19 {strides = array<i32>} : memref<8x128xf32, #tpu.memory_space<vmem>>, vector<8x128xf32>,
    } else {
    }
    %c0 = arith.constant 0 : index
    %c0_1 = arith.constant 0 : index
    %3 = vector.load %arg2[%c0, %c0_1] : memref<8x128xf32, #tpu.memory_space<vmem>>, vector<8x128xf32>
    %c0_2 = arith.constant 0 : index
    %c0_3 = arith.constant 0 : index
    %4 = vector.load %arg3[%c0_2, %c0_3] : memref<128x128xf32, #tpu.memory_space<vmem>>, vector<128x128xf32>
    %cst = arith.constant dense<0.000000e+00> : vector<8x128xf32>
    %5 = tpu.matmul %3, %4, %cst {dimension_numbers = #tpu.dot_dimension_numbers<[1], [0], [0], [1], [0, 0, 1, 1], [], []>} : vector<8x128xf32>, vector<128x128xf32>, vector<8x128xf32> -> vector<8x128xf32>
    %c0_4 = arith.constant 0 : index
    %c0_5 = arith.constant 0 : index
    %6 = vector.load %arg4[%c0_4, %c0_5] : memref<1x128xf32, #tpu.memory_space<vmem>>, vector<1x128xf32>
    %7 = vector.broadcast %6 : vector<1x128xf32> to vector<8x128xf32>
    %8 = arith.addf %5, %7 : vector<8x128xf32>
    %cst_6 = arith.constant 0.000000e+00 : f32
    %9 = vector.broadcast %cst_6 : f32 to vector<8x128xf32>
    %10 = arith.maximumf %8, %9 : vector<8x128xf32>
    %c0_7 = arith.constant 0 : index
    %c0_8 = arith.constant 0 : index
    %11 = vector.load %arg7[%c0_7, %c0_8] : memref<8x128xf32, #tpu.memory_space<vmem>>, vector<8x128xf32>
    %c0_9 = arith.constant 0 : index
    %c0_10 = arith.constant 0 : index
    %12 = vector.load %arg5[%c0_9, %c0_10] : memref<128x128xf32, #tpu.memory_space<vmem>>, vector<128x128xf32>
    %cst_11 = arith.constant dense<0.000000e+00> : vector<8x128xf32>
    %13 = tpu.matmul %10, %12, %cst_11 {dimension_numbers = #tpu.dot_dimension_numbers<[1], [0], [0], [1], [0, 0, 1, 1], [], []>} : vector<8x128xf32>, vector<128x128xf32>, vector<8x128xf32> -> vector<8x128xf32>
    %14 = arith.addf %11, %13 : vector<8x128xf32>
    %c0_12 = arith.constant 0 : index
    %c0_13 = arith.constant 0 : index
    %15 = vector.load %arg7[%c0_12, %c0_13] : memref<8x128xf32, #tpu.memory_space<vmem>>, vector<8x128xf32>
    tpu.vector_store %arg7[%c0_12, %c0_13], %14 {strides = array<i32>} : memref<8x128xf32, #tpu.memory_space<vmem>>, vector<8x128xf32>,
    %c0_i32_14 = arith.constant 0 : i32
    %16 = arith.cmpi eq, %arg1, %c0_i32_14 : i32
    %17 = arith.extui %16 : i1 to i32
    %c0_i32_15 = arith.constant 0 : i32
    %18 = arith.cmpi ne, %17, %c0_i32_15 : i32
    scf.if %18 {
      %c0_16 = arith.constant 0 : index
      %c0_17 = arith.constant 0 : index
      %19 = vector.load %arg7[%c0_16, %c0_17] : memref<8x128xf32, #tpu.memory_space<vmem>>, vector<8x128xf32>
      %c0_18 = arith.constant 0 : index
      %c0_19 = arith.constant 0 : index
      %20 = vector.load %arg6[%c0_18, %c0_19] : memref<1x128xf32, #tpu.memory_space<vmem>>, vector<1x128xf32>
      %21 = vector.broadcast %20 : vector<1x128xf32> to vector<8x128xf32>
      %22 = arith.addf %19, %21 : vector<8x128xf32>
      %c0_20 = arith.constant 0 : index
      %c0_21 = arith.constant 0 : index
      %23 = vector.load %arg7[%c0_20, %c0_21] : memref<8x128xf32, #tpu.memory_space<vmem>>, vector<8x128xf32>
      tpu.vector_store %arg7[%c0_20, %c0_21], %22 {strides = array<i32>} : memref<8x128xf32, #tpu.memory_space<vmem>>, vector<8x128xf32>,
    } else {
    }
    return
  }
  func.func @transform_0(%arg0: i32, %arg1: i32) -> (i32, i32) {
    %c0_i32 = arith.constant 0 : i32
    %c0_i32_0 = arith.constant 0 : i32
    return %arg0, %c0_i32 : i32, i32
  }
  func.func @transform_1(%arg0: i32, %arg1: i32) -> (i32, i32) {
    %c0_i32 = arith.constant 0 : i32
    %c0_i32_0 = arith.constant 0 : i32
    return %c0_i32, %arg1 : i32, i32
  }
  func.func @transform_2(%arg0: i32, %arg1: i32) -> (i32, i32) {
    %c0_i32 = arith.constant 0 : i32
    %c0_i32_0 = arith.constant 0 : i32
    return %c0_i32, %arg1 : i32, i32
  }
  func.func @transform_3(%arg0: i32, %arg1: i32) -> (i32, i32) {
    %c0_i32 = arith.constant 0 : i32
    %c0_i32_0 = arith.constant 0 : i32
    return %arg1, %c0_i32 : i32, i32
  }
  func.func @transform_4(%arg0: i32, %arg1: i32) -> (i32, i32) {
    %c0_i32 = arith.constant 0 : i32
    %c0_i32_0 = arith.constant 0 : i32
    %c0_i32_1 = arith.constant 0 : i32
    return %c0_i32, %c0_i32_0 : i32, i32
  }
  func.func @transform_5(%arg0: i32, %arg1: i32) -> (i32, i32) {
    %c0_i32 = arith.constant 0 : i32
    %c0_i32_0 = arith.constant 0 : i32
    return %arg0, %c0_i32 : i32, i32
  }
}

</mosaic_0001>

<bundles_post_ra>
// kernel: tpu_custom_call.1
= control target key start
LH: loop header
LB: loop body
LE: loop exit
PB: predicated region body
PF: predicated region fallthrough
CT: control target
= control target key end

     0   :  { %10 = vsyncpa [#allocation3], 0  ;;  %s1017_s0 = inlined_call_operand.hbm [shape: f32[16,128], index: 0, kind: input, shape index: {}]   ;;  %s1018_s1 = inlined_call_operand.hbm [shape: f32[128,128], index: 1, kind: input, shape index: {}]   ;;  %s1019_s2 = inlined_call_operand.vmem [shape: f32[1,128], index: 2, kind: input, shape index: {}]   ;;  %s1020_s3 = inlined_call_operand.hbm [shape: f32[128,128], index: 3, kind: input, shape index: {}]   ;;  %s1021_s4 = inlined_call_operand.vmem [shape: f32[1,128], index: 4, kind: input, shape index: {}]   ;;  %s1022_s5 = inlined_call_operand.hbm [shape: f32[16,128], index: 5, kind: output, shape index: {}]  }
   0x1   :  { %12 = vsyncpa [#allocation3 + $0x1], 0 }
   0x2   :  { %13 = vsyncpa [#allocation6], 0 }
   0x3   :  { %14 = vsyncpa [#allocation4], 0 }
   0x4   :  { %16 = vsyncpa [#allocation4 + $0x1], 0  ;;  %s860_s18 = smov 0   ;;  %s862_s19 = smov 0  }
   0x5   :  { %s864_s20 = smov 0   ;;  %s866_s21 = smov 0  }
   0x6   :  { %s868_s22 = smov 0   ;;  %s870_s23 = smov 0  }
   0x7 LB: > { %s542_s24 = sadd.s32 4294967295, %s824_s23   ;;  %p544_p0 = scmp.ge.s32.totalorder %s824_s23, 1  ;;  %s824_s23 = sphi %s870_s23, %s22_s23   ;;  %s820_s22 = sphi %s868_s22, %s1032_s22   ;;  %s816_s21 = sphi %s866_s21, %s1031_s21   ;;  %s812_s20 = sphi %s864_s20, %s1030_s20   ;;  %s808_s19 = sphi %s862_s19, %s1029_s19   ;;  %s804_s18 = sphi %s860_s18, %s1028_s18  }
   0x8   : > { %p894_p1 = scmp.eq.s32.totalorder %s542_s24, 0  ;;  %p190_p2 = scmp.lt.s32.totalorder %s824_s23, 3 }
   0x9   : > { %s203_s28 = sshll.u32 %s1018_s1, 4  ;;  %s826_s30 = smov [#allocation5]   ;;  %s204_s28 = int_to_ptr.hbm [resolvable:$true] %s203_s28 }
   0xa   : > { %p902_p3 = pnand %p544_p0, %p190_p2  ;;  %s205_s6 = sshll.u32 %s826_s30, 4  ;;  %s206_s6 = int_to_ptr.vmem [resolvable:$true] %s205_s6 }
   0xb   : > { %p548_p6 = scmp.ge.s32.totalorder %s824_s23, 2  ;;  %s226_s9 = sshll.u32 %s1020_s3, 4  ;;  %s227_s9 = int_to_ptr.hbm [resolvable:$true] %s226_s9 }
   0xc   : > { %p572_p4 = pneg %p902_p3  ;;  %s827_s10 = smov 128  }
   0xd   : > { %s828_s11 = smov 8   ;;  %s829_s12 = smov [#allocation7]  }
   0xe   : > { %p573_p5 = pnand %p572_p4, %p894_p1  ;;  %s228_s13 = sshll.u32 %s829_s12, 4  ;;  %s229_s13 = int_to_ptr.vmem [resolvable:$true] %s228_s13 }
   0xf   : > { %s34_s14 = sadd.s32 1, %s820_s22  ;;  %s543_s15 = sadd.s32 4294967294, %s824_s23  }
  0x10   : > { %575 = dma.hbm_to_vmem [thread:$0]  (!%p573_p5), %s204_s28, 2048, %s206_s6, [#allocation6], %s827_s10, %s827_s10, %s828_s11  }
  0x11   : > { %578 = dma.hbm_to_vmem [thread:$0]  (!%p573_p5), %s227_s9, 2048, %s229_s13, [#allocation6], %s827_s10, %s827_s10, %s828_s11  }
  0x12   : > { %p36_p7 = scmp.ge.s32.totalorder %s34_s14, 2  ;;  %s41_s16 = sadd.s32 1, %s812_s20 }
  0x13   : > { %p48_p8 = scmp.ne.s32.totalorder %s812_s20, %s808_s19  ;;  %p49_p9 = scmp.eq.s32.totalorder %s824_s23, 0 }
  0x14   : > { %s1034_s14 = smov (%p36_p7, %s34_s14), 0  ;;  %p54_p10 = scmp.ne.s32.totalorder %s808_s19, %s804_s18 }
  0x15   : > { %s38_s17 = ssub.s32 %s820_s22, %s1034_s14  ;;  %p177_p11 = scmp.eq.s32.totalorder %s542_s24, 1 }
  0x16   : > { %p39_p12 = scmp.eq.s32.totalorder %s38_s17, 0  ;;  %p930_p13 = por %p894_p1, %p54_p10 }
  0x17   : > { %p934_p0 = por %p177_p11, %p48_p8  ;;  %p183_p2 = scmp.eq.s32.totalorder %s543_s15, 1 }
  0x18   : > { %s939_s28 = scalar_select %p39_p12, %s812_s20, %s41_s16  }
  0x19   : > { %p50_p4 = por %p49_p9, %p48_p8  ;;  %p941_p5 = por %p183_p2, %p54_p10 }
  0x1a   : > { %s245_s6 = sand.u32 1, %s812_s20   ;;  %s550_s24 = sshll.u32 %s820_s22, 3 }
  0x1b   : > { %p589_p7 = scmp.lt.s32.totalorder %s824_s23, 2  ;;  %s549_s7 = sshll.u32 %s245_s6, 3 }
  0x1c   : > { %s253_s10 = scalar_lea.hbm %s1017_s0, %s550_s24  ;;  %s249_s12 = scalar_lea.vmem [#allocation2], %s549_s7 }
  0x1d   : > { %s255_s11 = sshll.u32 %s253_s10, 4  ;;  %s257_s13 = sshll.u32 %s249_s12, 4  ;;  %s256_s11 = int_to_ptr.hbm [resolvable:$true] %s255_s11  ;;  %s258_s13 = int_to_ptr.vmem [resolvable:$true] %s257_s13 }
  0x1e   : > { %p580_p11 = pnand %p589_p7, %p50_p4  ;;  %s246_s15 = scalar_lea.sflag [#allocation3], %s245_s6 }
  0x1f   : > { %266 = sbr.rel (%p902_p3) target bundleno = 332 (0x14c), region = 40  ;;  %s954_s16 = sand.u32 (!%p902_p3), 1, %s808_s19  }
  0x20   : > { %582 = dma.hbm_to_vmem [thread:$0]  (!%p580_p11), %s256_s11, 128, %s258_s13, %s246_s15  }
  0x21   : > { %s552_s17 = sshll.u32 (!%p902_p3), %s954_s16, 3  ;;  %s269_s24 = scalar_lea.sflag (!%p902_p3), [#allocation3], %s954_s16 }
  0x22   : > { %s960_s7 = scalar_lea.vmem (!%p902_p3), [#allocation2], %s552_s17 }
  0x24   : > { %791 = dma.done.wait (%p930_p13), %s269_s24, 128  }
  0x25   : > { %793 = vsyncadd (%p930_p13), %s269_s24, 4294967168 }
  0x26   : > { %795 = dma.done.wait (%p894_p1), [#allocation6], 4096  }
  0x27   : > { %797 = vsyncadd (%p894_p1), [#allocation6], 4294963200  ;;  %v338_v0 = vld [vmem:[#allocation5 + $0x78] sm:$0xff]  ;;  %v337_v1 = vld [vmem:[#allocation5 + $0x70] sm:$0xff]  ;;  %s557_s26 = sshll.u32 %s816_s21, 3  ;;  %s312_s12 = scalar_lea.vmem [#allocation8], %s552_s17 }
  0x28   : > { %343 = vmatpush.msra.mxu0 %v338_v0  ;;  %v336_v2 = vld [vmem:[#allocation5 + $0x68] sm:$0xff]  ;;  %v335_v3 = vld [vmem:[#allocation5 + $0x60] sm:$0xff]  ;;  %v380_v4 = vld [vmem:[#allocation7 + $0x78] sm:$0xff]  ;;  %s424_s9 = scalar_lea.hbm %s1022_s5, %s557_s26  ;;  %s426_s13 = sshll.u32 %s312_s12, 4  ;;  %s427_s13 = int_to_ptr.vmem [resolvable:$true] %s426_s13 }
  0x29   : > { %v334_v5 = vld [vmem:[#allocation5 + $0x58] sm:$0xff]  ;;  %381 = vmatpush.msra.mxu1 %v380_v4  ;;  %v379_v6 = vld [vmem:[#allocation7 + $0x70] sm:$0xff]  ;;  %v378_v7 = vld [vmem:[#allocation7 + $0x68] sm:$0xff]  ;;  %s428_s15 = sshll.u32 %s424_s9, 4  ;;  %s414_s24 = scalar_lea.sflag [#allocation4], %s954_s16  ;;  %s429_s15 = int_to_ptr.hbm [resolvable:$true] %s428_s15 }
  0x2a   : > { %344 = vmatpush.msra.mxu0 %v337_v1  ;;  %v333_v8 = vld [vmem:[#allocation5 + $0x50] sm:$0xff]  ;;  %v377_v9 = vld [vmem:[#allocation7 + $0x60] sm:$0xff]  ;;  %v332_v10 = vld [vmem:[#allocation5 + $0x48] sm:$0xff]  ;;  %s752_s21 = sshra.s32 %s429_s15, 4  ;;  %s758_s26 = scalar_lea.hbm %s1022_s5, 16  ;;  %s753_s21 = int_to_ptr.hbm [resolvable:$true] %s752_s21 }
  0x2b   : > { %382 = vmatpush.msra.mxu1 %v379_v6  ;;  %v376_v11 = vld [vmem:[#allocation7 + $0x58] sm:$0xff]  ;;  %v331_v12 = vld [vmem:[#allocation5 + $0x40] sm:$0xff]  ;;  %v375_v13 = vld [vmem:[#allocation7 + $0x50] sm:$0xff]  ;;  %p759_p9 = scmp.lt.s32.totalorder %s753_s21, %s1022_s5 }
  0x2c   : > { %345 = vmatpush.msra.mxu0 %v336_v2  ;;  %v330_v14 = vld [vmem:[#allocation5 + $0x38] sm:$0xff]  ;;  %v374_v15 = vld [vmem:[#allocation7 + $0x48] sm:$0xff]  ;;  %v329_v16 = vld [vmem:[#allocation5 + $0x30] sm:$0xff] }
  0x2d   : > { %383 = vmatpush.msra.mxu1 %v378_v7  ;;  %v373_v17 = vld [vmem:[#allocation7 + $0x40] sm:$0xff]  ;;  %v328_v18 = vld [vmem:[#allocation5 + $0x28] sm:$0xff]  ;;  %v372_v19 = vld [vmem:[#allocation7 + $0x38] sm:$0xff] }
  0x2e   : > { %346 = vmatpush.msra.mxu0 %v335_v3  ;;  %v327_v20 = vld [vmem:[#allocation5 + $0x20] sm:$0xff]  ;;  %v371_v21 = vld [vmem:[#allocation7 + $0x30] sm:$0xff]  ;;  %v326_v22 = vld [vmem:[#allocation5 + $0x18] sm:$0xff] }
  0x2f   : > { %384 = vmatpush.msra.mxu1 %v377_v9  ;;  %v370_v23 = vld [vmem:[#allocation7 + $0x28] sm:$0xff]  ;;  %v325_v24 = vld [vmem:[#allocation5 + $0x10] sm:$0xff]  ;;  %v369_v25 = vld [vmem:[#allocation7 + $0x20] sm:$0xff] }
  0x30   : > { %347 = vmatpush.msra.mxu0 %v334_v5  ;;  %v324_v26 = vld [vmem:[#allocation5 + $0x8] sm:$0xff]  ;;  %v368_v27 = vld [vmem:[#allocation7 + $0x18] sm:$0xff]  ;;  %v323_v28 = vld [vmem:[#allocation5] sm:$0xff] }
  0x31   : > { %385 = vmatpush.msra.mxu1 %v376_v11  ;;  %v322_v29 = vld [vmem:[%s960_s7] sm:$0xff]  ;;  %v366_v31 = vld [vmem:[#allocation7 + $0x8] sm:$0xff]  ;;  %v365_v32 = vld [vmem:[#allocation7] sm:$0xff]  ;;  %s754_s7 = scalar_lea.hbm %s753_s21, 8 }
  0x32   : > { %348 = vmatpush.msra.mxu0 %v333_v8  ;;  %v367_v30 = vld [vmem:[#allocation7 + $0x10] sm:$0xff]  ;;  %p755_p1 = scmp.ne.s32.totalorder %s753_s21, %s754_s7  ;;  %p760_p10 = scmp.lt.s32.totalorder %s758_s26, %s754_s7 }
  0x33   : > { %386 = vmatpush.msra.mxu1 %v375_v13  ;;  %v646_v33 = vld [vmem:[%s1019_s2] ss:$0 sm:$0xff] }
  0x34   : > { %349 = vmatpush.msra.mxu0 %v332_v10  ;;  %v647_v37 = vld [vmem:[%s1021_s4] ss:$0 sm:$0xff]  ;;  %p756_p3 = pnand %p755_p1, %p934_p0  ;;  %p761_p12 = por %p760_p10, %p759_p9 }
  0x35   : > { %387 = vmatpush.msra.mxu1 %v374_v15 }
  0x36   : > { %350 = vmatpush.msra.mxu0 %v331_v12  ;;  %p757_p8 = pneg %p756_p3 }
  0x37   : > { %388 = vmatpush.msra.mxu1 %v373_v17 }
  0x38   : > { %351 = vmatpush.msra.mxu0 %v330_v14  ;;  %p762_p13 = pnand %p761_p12, %p757_p8 }
  0x39   : > { %389 = vmatpush.msra.mxu1 %v372_v19 }
  0x3a   : > { %352 = vmatpush.msra.mxu0 %v329_v16 }
  0x3b   : > { %390 = vmatpush.msra.mxu1 %v371_v21 }
  0x3c   : > { %353 = vmatpush.msra.mxu0 %v328_v18 }
  0x3d   : > { %391 = vmatpush.msra.mxu1 %v370_v23 }
  0x3e   : > { %354 = vmatpush.msra.mxu0 %v327_v20 }
  0x3f   : > { %392 = vmatpush.msra.mxu1 %v369_v25 }
  0x40   : > { %355 = vmatpush.msra.mxu0 %v326_v22 }
  0x41   : > { %393 = vmatpush.msra.mxu1 %v368_v27 }
  0x42   : > { %356 = vmatpush.msra.mxu0 %v325_v24 }
  0x43   : > { %394 = vmatpush.msra.mxu1 %v367_v30 }
  0x44   : > { %357 = vmatpush.msra.mxu0 %v324_v26 }
  0x45   : > { %395 = vmatpush.msra.mxu1 %v366_v31 }
  0x46   : > { %358 = vmatpush.msra.mxu0 %v323_v28 }
  0x47   : > { %359 = vmatmul.f32.vlgmr.msra.gmra.mxu0 %v322_v29  ;;  %396 = vmatpush.msra.mxu1 %v365_v32 }
  0xc4   : > { %v360_v34 = vpop.f32.mrf.mxu0 }
  0xc5   : > { %v361_v35 = vadd.f32 %v646_v33, %v360_v34 }
  0xc7   : > { %v363_v36 = vmax.f32 %v361_v35, 0.0 }
  0xc9   : > { %397 = vmatmul.f32.vlgmr.msra.gmra.mxu1 %v363_v36 }
 0x146   : > { %v398_v38 = vpop.f32.mrf.mxu1 }
 0x147   : > { %v411_v39 = vadd.f32 %v647_v37, %v398_v38 }
 0x149   : > { %412 = vst [vmem:[%s312_s12] sm:$0xff] %v411_v39 }
 0x14a   : > { %765 = shalt.err (!%p762_p13)
}
 0x14b   : > { %570 = dma.vmem_to_hbm [thread:$0]  (%p934_p0), %s427_s13, 128, %s429_s15, %s414_s24  }
 0x14c PF: > { %s440_s16 = sand.u32 1, %s804_s18   ;;  %p584_p2 = pnand %p548_p6, %p941_p5 }
 0x14d   : > { %s441_s8 = scalar_lea.sflag [#allocation4], %s440_s16 }
 0x14e   : > { %p585_p4 = pneg %p584_p2 }
 0x150   : > { %799 = dma.done.wait (%p585_p4), %s441_s8, 128  }
 0x151   : > { %801 = vsyncadd (%p585_p4), %s441_s8, 4294967168  ;;  %s22_s23 = sadd.s32 1, %s824_s23   ;;  %s1028_s18 = smov %s808_s19 }
 0x152   : > { %p19_p7 = scmp.ge.s32.totalorder %s22_s23, 4   ;;  %s1029_s19 = smov %s812_s20 }
 0x153   : > { %s1030_s20 = smov %s939_s28  ;;  %s1031_s21 = smov %s820_s22 }
 0x154   : > { %s1032_s22 = smov %s1034_s14  ;;  %21 = sbr.rel (!%p19_p7) target bundleno = 7 (0x7), region = 106 }
 0x159   :  { %447 = vsyncpa [#allocation3], 1 }
 0x15a   :  { %449 = vsyncpa [#allocation3 + $0x1], 1 }
 0x15b   :  { %450 = vsyncpa [#allocation6], 1 }
 0x15c   :  { %451 = vsyncpa [#allocation4], 1 }
 0x15d   :  { %453 = vsyncpa [#allocation4 + $0x1], 1 }

</bundles_post_ra>
